<compile_context>
chip_gen: v5e
topology: v5e:2x2
jax: 0.10.0
libtpu: 0.0.40
codegen_flags: <defaults>
</compile_context>

<pallas_src>
import functools

import numpy as np
import jax
import jax.numpy as jnp
from jax import lax
from jax.experimental import pallas as pl
from jax.experimental.pallas import tpu as pltpu

KSIZE = 7
PAD = (KSIZE - 1) // 2  # 3


def _spatial_gate_kernel(x_ref, m_ref, shift_ref, o_ref, tpad_ref, *, T, TP):
    # x_ref:    (1, C, T, HW)            VMEM block (one batch element, lane-dense)
    # m_ref:    (2*KSIZE*HW, HW)         VMEM, BN-folded Toeplitz conv operator
    # shift_ref:(1,)                     SMEM, BN-folded bias
    # o_ref:    (1, C, T, HW)            VMEM output block
    # tpad_ref: (2, TP + 2*PAD, HW)      VMEM scratch (time-halo-padded pooled maps)
    x = x_ref[0].astype(jnp.float32)                # (C, T, HW)

    # ChannelPool: max / mean over the channel axis (VPU, cheap).
    cmax = jnp.max(x, axis=0)                       # (T, HW)
    cmean = jnp.mean(x, axis=0)                     # (T, HW)

    # Time-only halo scratch.  Spatial "same" padding is baked into m_ref, so
    # only the T axis needs a zero halo.  Re-zero every step: the scratch is
    # tiny, and with a "parallel" batch axis a program_id==0 one-shot init
    # would not run on every core.
    tpad_ref[...] = jnp.zeros_like(tpad_ref)
    tpad_ref[0, PAD:PAD + T, :] = cmax
    tpad_ref[1, PAD:PAD + T, :] = cmean

    # 2x7x7x7 "same" conv as a single MXU matmul:
    #   lhs[t, (c*7+kt)*HW + s] = pooled_pad[c, t + kt - 3, s]
    #   out = lhs @ m_ref                (TP, HW)
    slabs = [tpad_ref[c, kt:kt + TP, :] for c in range(2) for kt in range(KSIZE)]
    lhs = jnp.concatenate(slabs, axis=1)            # (TP, 2*KSIZE*HW)
    conv = jnp.dot(lhs, m_ref[...], preferred_element_type=jnp.float32)  # (TP, HW)
    conv = conv[:T]                                 # drop sublane-padding rows

    # Folded BatchNorm (inference) + sigmoid gate, broadcast over channels.
    scale = jax.nn.sigmoid(conv + shift_ref[0])     # (T, HW)
    o_ref[0] = (x * scale[None, :, :]).astype(o_ref.dtype)


def _build_toeplitz(w_folded, H, W):
    """Banded operator M[(c*7+kt)*HW + s_in, s_out] implementing the spatial
    (kh, kw) part of the 7x7x7 'same' conv on the flattened H*W axis, with the
    spatial zero-padding baked in (out-of-bounds taps dropped)."""
    HW = H * W
    A = np.zeros((KSIZE, KSIZE, HW, HW), np.float32)
    for kh in range(KSIZE):
        for kw in range(KSIZE):
            for h in range(H):
                hi = h + kh - PAD
                if not (0 <= hi < H):
                    continue
                for w in range(W):
                    wi = w + kw - PAD
                    if 0 <= wi < W:
                        A[kh, kw, hi * W + wi, h * W + w] = 1.0
    # w_folded: (2, 7, 7, 7) indexed [c, kt, kh, kw]
    toe = jnp.einsum("ctab,abio->ctio", w_folded, jnp.asarray(A))
    return toe.reshape(2 * KSIZE * HW, HW)


def spatial_gate(x, conv_w, bn_gamma, bn_beta, bn_mean, bn_var, *, eps=1e-5):
    """x: (N, C, T, H, W) f32;  conv_w: (1, 2, 7, 7, 7);  bn_*: (1,)."""
    N, C, T, H, W = x.shape
    HW = H * W
    TP = ((T + 7) // 8) * 8  # pad the matmul M-dim up to a sublane multiple

    # Fold inference-mode BatchNorm3d into the bias-free conv:
    #   bn(conv(x)) = conv(x)*gamma/sqrt(var+eps) + (beta - mean*gamma/sqrt(var+eps))
    bn_scale = bn_gamma / jnp.sqrt(bn_var + eps)                       # (1,)
    w_folded = (conv_w.astype(jnp.float32) * bn_scale).reshape(
        2, KSIZE, KSIZE, KSIZE)
    shift = (bn_beta - bn_mean * bn_scale).reshape(1).astype(jnp.float32)

    toeplitz = _build_toeplitz(w_folded, H, W)                          # (2*7*HW, HW)

    # Lane-dense layout: last block dim is H*W (ideally a multiple of 128).
    x_flat = x.reshape(N, C, T, HW)

    kernel = functools.partial(_spatial_gate_kernel, T=T, TP=TP)
    out = pl.pallas_call(
        kernel,
        out_shape=jax.ShapeDtypeStruct((N, C, T, HW), x.dtype),
        grid=(N,),
        in_specs=[
            pl.BlockSpec((1, C, T, HW), lambda n: (n, 0, 0, 0)),
            pl.BlockSpec((2 * KSIZE * HW, HW), lambda n: (0, 0)),  # grid-constant
            pl.BlockSpec(memory_space=pltpu.MemorySpace.SMEM),
        ],
        out_specs=pl.BlockSpec((1, C, T, HW), lambda n: (n, 0, 0, 0)),
        scratch_shapes=[
            pltpu.VMEM((2, TP + 2 * PAD, HW), jnp.float32),
        ],
        compiler_params=pltpu.CompilerParams(
            dimension_semantics=("parallel",),       # shard batch across TCs (v7x)
            vmem_limit_bytes=64 * 1024 * 1024,
        ),
    )(x_flat, toeplitz, shift)
    return out.reshape(N, C, T, H, W)


def spatial_gate_reference(x, conv_w, bn_gamma, bn_beta, bn_mean, bn_var, *, eps=1e-5):
    """Pure-JAX reference mirroring the PyTorch forward (BN in eval mode)."""
    cmax = jnp.max(x, axis=1, keepdims=True)
    cmean = jnp.mean(x, axis=1, keepdims=True)
    comp = jnp.concatenate([cmax, cmean], axis=1)                  # (N, 2, T, H, W)
    out = lax.conv_general_dilated(
        comp, conv_w, window_strides=(1, 1, 1),
        padding=[(PAD, PAD)] * 3,
        dimension_numbers=("NCDHW", "OIDHW", "NCDHW"))             # (N, 1, T, H, W)
    out = (out - bn_mean[0]) / jnp.sqrt(bn_var[0] + eps) * bn_gamma[0] + bn_beta[0]
    return x * jax.nn.sigmoid(out)


if __name__ == "__main__":
    key = jax.random.PRNGKey(0)
    k_x, k_w = jax.random.split(key)

    # H*W = 128 -> lane-dense blocks; T = 8 -> sublane-aligned matmul M-dim.
    N, C, T, H, W = 2, 4, 8, 8, 16
    x = jax.random.normal(k_x, (N, C, T, H, W), jnp.float32)

    # Deterministic parameters: Conv3d(2, 1, 7, padding=3, bias=False) + BatchNorm3d(1).
    fan_in = 2 * KSIZE ** 3
    bound = 1.0 / (fan_in ** 0.5)
    conv_w = jax.random.uniform(
        k_w, (1, 2, KSIZE, KSIZE, KSIZE), jnp.float32, minval=-bound, maxval=bound)
    bn_gamma = jnp.array([1.2], jnp.float32)
    bn_beta = jnp.array([-0.1], jnp.float32)
    bn_mean = jnp.array([0.05], jnp.float32)
    bn_var = jnp.array([0.8], jnp.float32)

    out = spatial_gate(x, conv_w, bn_gamma, bn_beta, bn_mean, bn_var)
    out = jax.block_until_ready(out)

    ref = spatial_gate_reference(x, conv_w, bn_gamma, bn_beta, bn_mean, bn_var)
    assert out.shape == x.shape and out.dtype == x.dtype
    max_err = float(jnp.max(jnp.abs(out - ref)))
    assert max_err < 1e-3, f"max_err={max_err}"

    print("KERNEL_OK")
</pallas_src>

<mosaic_0001>
module attributes {stable_mosaic.version = 11 : i64} {
  func.func @_spatial_gate_kernel(%arg0: i32, %arg1: memref<1x4x8x128xf32, #tpu.memory_space<vmem>>, %arg2: memref<1792x128xf32, #tpu.memory_space<vmem>>, %arg3: memref<1xf32, #tpu.memory_space<smem>>, %arg4: memref<1x4x8x128xf32, #tpu.memory_space<vmem>>, %arg5: memref<2x14x128xf32, #tpu.memory_space<vmem>>) attributes {dimension_semantics = [#tpu.dimension_semantics<parallel>], iteration_bounds = array<i64: 2>, scalar_prefetch = 0 : i64, scratch_operands = 1 : i64, tpu.core_type = #tpu.core_type<tc>, window_params = [{transform_indices = @transform_0, window_bounds = array<i64: 1, 4, 8, 128>}, {pipeline_mode = #tpu.pipeline_mode<synchronous>, transform_indices = @transform_1, window_bounds = array<i64: 1792, 128>}, {transform_indices = @transform_2, window_bounds = array<i64: 1>}, {transform_indices = @transform_3, window_bounds = array<i64: 1, 4, 8, 128>}]} {
    %c0 = arith.constant 0 : index
    %c0_0 = arith.constant 0 : index
    %c0_1 = arith.constant 0 : index
    %c0_2 = arith.constant 0 : index
    %0 = vector.load %arg1[%c0, %c0_0, %c0_1, %c0_2] : memref<1x4x8x128xf32, #tpu.memory_space<vmem>>, vector<1x4x8x128xf32>
    %1 = vector.shape_cast %0 : vector<1x4x8x128xf32> to vector<4x8x128xf32>
    %cst = arith.constant dense<0xFF800000> : vector<8x128xf32>
    %2 = vector.multi_reduction <maximumf>, %1, %cst [0] : vector<4x8x128xf32> to vector<8x128xf32>
    %cst_3 = arith.constant dense<0.000000e+00> : vector<8x128xf32>
    %3 = vector.multi_reduction <add>, %1, %cst_3 [0] : vector<4x8x128xf32> to vector<8x128xf32>
    %cst_4 = arith.constant 4.000000e+00 : f32
    %4 = vector.broadcast %cst_4 : f32 to vector<8x128xf32>
    %5 = arith.divf %3, %4 : vector<8x128xf32>
    %cst_5 = arith.constant 0.000000e+00 : f32
    %6 = vector.broadcast %cst_5 : f32 to vector<2x14x128xf32>
    %c0_6 = arith.constant 0 : index
    %c0_7 = arith.constant 0 : index
    %c0_8 = arith.constant 0 : index
    %7 = vector.load %arg5[%c0_6, %c0_7, %c0_8] : memref<2x14x128xf32, #tpu.memory_space<vmem>>, vector<2x14x128xf32>
    tpu.vector_store %arg5[%c0_6, %c0_7, %c0_8], %6 {strides = array<i32>} : memref<2x14x128xf32, #tpu.memory_space<vmem>>, vector<2x14x128xf32>,
    %c0_9 = arith.constant 0 : index
    %c3 = arith.constant 3 : index
    %c0_10 = arith.constant 0 : index
    %8 = vector.load %arg5[%c0_9, %c3, %c0_10] : memref<2x14x128xf32, #tpu.memory_space<vmem>>, vector<1x8x128xf32>
    %9 = vector.shape_cast %8 : vector<1x8x128xf32> to vector<8x128xf32>
    %10 = vector.shape_cast %2 : vector<8x128xf32> to vector<1x8x128xf32>
    tpu.vector_store %arg5[%c0_9, %c3, %c0_10], %10 {strides = array<i32>} : memref<2x14x128xf32, #tpu.memory_space<vmem>>, vector<1x8x128xf32>,
    %c1 = arith.constant 1 : index
    %c3_11 = arith.constant 3 : index
    %c0_12 = arith.constant 0 : index
    %11 = vector.load %arg5[%c1, %c3_11, %c0_12] : memref<2x14x128xf32, #tpu.memory_space<vmem>>, vector<1x8x128xf32>
    %12 = vector.shape_cast %11 : vector<1x8x128xf32> to vector<8x128xf32>
    %13 = vector.shape_cast %5 : vector<8x128xf32> to vector<1x8x128xf32>
    tpu.vector_store %arg5[%c1, %c3_11, %c0_12], %13 {strides = array<i32>} : memref<2x14x128xf32, #tpu.memory_space<vmem>>, vector<1x8x128xf32>,
    %c0_13 = arith.constant 0 : index
    %c0_14 = arith.constant 0 : index
    %c0_15 = arith.constant 0 : index
    %14 = vector.load %arg5[%c0_13, %c0_14, %c0_15] : memref<2x14x128xf32, #tpu.memory_space<vmem>>, vector<1x8x128xf32>
    %15 = vector.shape_cast %14 : vector<1x8x128xf32> to vector<8x128xf32>
    %c0_16 = arith.constant 0 : index
    %c1_17 = arith.constant 1 : index
    %c0_18 = arith.constant 0 : index
    %16 = vector.load %arg5[%c0_16, %c1_17, %c0_18] : memref<2x14x128xf32, #tpu.memory_space<vmem>>, vector<1x8x128xf32>
    %17 = vector.shape_cast %16 : vector<1x8x128xf32> to vector<8x128xf32>
    %c0_19 = arith.constant 0 : index
    %c2 = arith.constant 2 : index
    %c0_20 = arith.constant 0 : index
    %18 = vector.load %arg5[%c0_19, %c2, %c0_20] : memref<2x14x128xf32, #tpu.memory_space<vmem>>, vector<1x8x128xf32>
    %19 = vector.shape_cast %18 : vector<1x8x128xf32> to vector<8x128xf32>
    %c0_21 = arith.constant 0 : index
    %c3_22 = arith.constant 3 : index
    %c0_23 = arith.constant 0 : index
    %20 = vector.load %arg5[%c0_21, %c3_22, %c0_23] : memref<2x14x128xf32, #tpu.memory_space<vmem>>, vector<1x8x128xf32>
    %21 = vector.shape_cast %20 : vector<1x8x128xf32> to vector<8x128xf32>
    %c0_24 = arith.constant 0 : index
    %c4 = arith.constant 4 : index
    %c0_25 = arith.constant 0 : index
    %22 = vector.load %arg5[%c0_24, %c4, %c0_25] : memref<2x14x128xf32, #tpu.memory_space<vmem>>, vector<1x8x128xf32>
    %23 = vector.shape_cast %22 : vector<1x8x128xf32> to vector<8x128xf32>
    %c0_26 = arith.constant 0 : index
    %c5 = arith.constant 5 : index
    %c0_27 = arith.constant 0 : index
    %24 = vector.load %arg5[%c0_26, %c5, %c0_27] : memref<2x14x128xf32, #tpu.memory_space<vmem>>, vector<1x8x128xf32>
    %25 = vector.shape_cast %24 : vector<1x8x128xf32> to vector<8x128xf32>
    %c0_28 = arith.constant 0 : index
    %c6 = arith.constant 6 : index
    %c0_29 = arith.constant 0 : index
    %26 = vector.load %arg5[%c0_28, %c6, %c0_29] : memref<2x14x128xf32, #tpu.memory_space<vmem>>, vector<1x8x128xf32>
    %27 = vector.shape_cast %26 : vector<1x8x128xf32> to vector<8x128xf32>
    %c1_30 = arith.constant 1 : index
    %c0_31 = arith.constant 0 : index
    %c0_32 = arith.constant 0 : index
    %28 = vector.load %arg5[%c1_30, %c0_31, %c0_32] : memref<2x14x128xf32, #tpu.memory_space<vmem>>, vector<1x8x128xf32>
    %29 = vector.shape_cast %28 : vector<1x8x128xf32> to vector<8x128xf32>
    %c1_33 = arith.constant 1 : index
    %c1_34 = arith.constant 1 : index
    %c0_35 = arith.constant 0 : index
    %30 = vector.load %arg5[%c1_33, %c1_34, %c0_35] : memref<2x14x128xf32, #tpu.memory_space<vmem>>, vector<1x8x128xf32>
    %31 = vector.shape_cast %30 : vector<1x8x128xf32> to vector<8x128xf32>
    %c1_36 = arith.constant 1 : index
    %c2_37 = arith.constant 2 : index
    %c0_38 = arith.constant 0 : index
    %32 = vector.load %arg5[%c1_36, %c2_37, %c0_38] : memref<2x14x128xf32, #tpu.memory_space<vmem>>, vector<1x8x128xf32>
    %33 = vector.shape_cast %32 : vector<1x8x128xf32> to vector<8x128xf32>
    %c1_39 = arith.constant 1 : index
    %c3_40 = arith.constant 3 : index
    %c0_41 = arith.constant 0 : index
    %34 = vector.load %arg5[%c1_39, %c3_40, %c0_41] : memref<2x14x128xf32, #tpu.memory_space<vmem>>, vector<1x8x128xf32>
    %35 = vector.shape_cast %34 : vector<1x8x128xf32> to vector<8x128xf32>
    %c1_42 = arith.constant 1 : index
    %c4_43 = arith.constant 4 : index
    %c0_44 = arith.constant 0 : index
    %36 = vector.load %arg5[%c1_42, %c4_43, %c0_44] : memref<2x14x128xf32, #tpu.memory_space<vmem>>, vector<1x8x128xf32>
    %37 = vector.shape_cast %36 : vector<1x8x128xf32> to vector<8x128xf32>
    %c1_45 = arith.constant 1 : index
    %c5_46 = arith.constant 5 : index
    %c0_47 = arith.constant 0 : index
    %38 = vector.load %arg5[%c1_45, %c5_46, %c0_47] : memref<2x14x128xf32, #tpu.memory_space<vmem>>, vector<1x8x128xf32>
    %39 = vector.shape_cast %38 : vector<1x8x128xf32> to vector<8x128xf32>
    %c1_48 = arith.constant 1 : index
    %c6_49 = arith.constant 6 : index
    %c0_50 = arith.constant 0 : index
    %40 = vector.load %arg5[%c1_48, %c6_49, %c0_50] : memref<2x14x128xf32, #tpu.memory_space<vmem>>, vector<1x8x128xf32>
    %41 = vector.shape_cast %40 : vector<1x8x128xf32> to vector<8x128xf32>
    %42 = tpu.concatenate %15, %17, %19, %21, %23, %25, %27, %29, %31, %33, %35, %37, %39, %41 in 1 : vector<8x128xf32>, vector<8x128xf32>, vector<8x128xf32>, vector<8x128xf32>, vector<8x128xf32>, vector<8x128xf32>, vector<8x128xf32>, vector<8x128xf32>, vector<8x128xf32>, vector<8x128xf32>, vector<8x128xf32>, vector<8x128xf32>, vector<8x128xf32>, vector<8x128xf32> -> vector<8x1792xf32>
    %c0_51 = arith.constant 0 : index
    %c0_52 = arith.constant 0 : index
    %43 = vector.load %arg2[%c0_51, %c0_52] : memref<1792x128xf32, #tpu.memory_space<vmem>>, vector<1792x128xf32>
    %cst_53 = arith.constant dense<0.000000e+00> : vector<8x128xf32>
    %44 = tpu.matmul %42, %43, %cst_53 {dimension_numbers = #tpu.dot_dimension_numbers<[1], [0], [0], [1], [0, 0, 1, 1], [], []>} : vector<8x1792xf32>, vector<1792x128xf32>, vector<8x128xf32> -> vector<8x128xf32>
    %c0_54 = arith.constant 0 : index
    %45 = memref.load %arg3[%c0_54] : memref<1xf32, #tpu.memory_space<smem>>
    %46 = vector.broadcast %45 : f32 to vector<8x128xf32>
    %47 = arith.addf %44, %46 : vector<8x128xf32>
    %48 = arith.negf %47 : vector<8x128xf32>
    %49 = math.exp %48 : vector<8x128xf32>
    %cst_55 = arith.constant 1.000000e+00 : f32
    %50 = vector.broadcast %cst_55 : f32 to vector<8x128xf32>
    %51 = arith.addf %50, %49 : vector<8x128xf32>
    %52 = arith.divf %50, %51 : vector<8x128xf32>
    %53 = vector.shape_cast %52 : vector<8x128xf32> to vector<1x8x128xf32>
    %54 = vector.broadcast %53 : vector<1x8x128xf32> to vector<4x8x128xf32>
    %55 = arith.mulf %1, %54 : vector<4x8x128xf32>
    %c0_56 = arith.constant 0 : index
    %c0_57 = arith.constant 0 : index
    %c0_58 = arith.constant 0 : index
    %c0_59 = arith.constant 0 : index
    %56 = vector.load %arg4[%c0_56, %c0_57, %c0_58, %c0_59] : memref<1x4x8x128xf32, #tpu.memory_space<vmem>>, vector<1x4x8x128xf32>
    %57 = vector.shape_cast %56 : vector<1x4x8x128xf32> to vector<4x8x128xf32>
    %58 = vector.shape_cast %55 : vector<4x8x128xf32> to vector<1x4x8x128xf32>
    tpu.vector_store %arg4[%c0_56, %c0_57, %c0_58, %c0_59], %58 {strides = array<i32>} : memref<1x4x8x128xf32, #tpu.memory_space<vmem>>, vector<1x4x8x128xf32>,
    return
  }
  func.func @transform_0(%arg0: i32) -> (i32, i32, i32, i32) {
    %c0_i32 = arith.constant 0 : i32
    %c0_i32_0 = arith.constant 0 : i32
    %c0_i32_1 = arith.constant 0 : i32
    %c0_i32_2 = arith.constant 0 : i32
    return %arg0, %c0_i32, %c0_i32_0, %c0_i32_1 : i32, i32, i32, i32
  }
  func.func @transform_1(%arg0: i32) -> (i32, i32) {
    %c0_i32 = arith.constant 0 : i32
    %c0_i32_0 = arith.constant 0 : i32
    %c0_i32_1 = arith.constant 0 : i32
    return %c0_i32, %c0_i32_0 : i32, i32
  }
  func.func @transform_2(%arg0: i32) -> i32 {
    %c0_i32 = arith.constant 0 : i32
    %c0_i32_0 = arith.constant 0 : i32
    return %c0_i32 : i32
  }
  func.func @transform_3(%arg0: i32) -> (i32, i32, i32, i32) {
    %c0_i32 = arith.constant 0 : i32
    %c0_i32_0 = arith.constant 0 : i32
    %c0_i32_1 = arith.constant 0 : i32
    %c0_i32_2 = arith.constant 0 : i32
    return %arg0, %c0_i32, %c0_i32_0, %c0_i32_1 : i32, i32, i32, i32
  }
}

</mosaic_0001>

<bundles_post_ra>
// kernel: tpu_custom_call.1
= control target key start
LH: loop header
LB: loop body
LE: loop exit
PB: predicated region body
PF: predicated region fallthrough
CT: control target
= control target key end

     0   :  { %s1319_s0 = inlined_call_operand.hbm [shape: f32[2,4,8,128], index: 0, kind: input, shape index: {}]   ;;  %s1320_s1 = inlined_call_operand.hbm [shape: f32[1792,128], index: 1, kind: input, shape index: {}]   ;;  %s1321_s2 = inlined_call_operand.<no memory space> [shape: f32[1], index: 2, kind: input, shape index: {}]   ;;  %s1322_s3 = inlined_call_operand.hbm [shape: f32[2,4,8,128], index: 3, kind: output, shape index: {}]  }
   0x1   :  { %8 = sst [smem:[#allocation3]] %s1321_s2 }
   0x2   :  { %9 = vsyncpa [#allocation5], 0 }
   0x3   :  { %11 = vsyncpa [#allocation5 + $0x1], 0 }
   0x4   :  { %12 = vsyncpa [#allocation8], 0 }
   0x5   :  { %13 = vsyncpa [#allocation6], 0 }
   0x6   :  { %15 = vsyncpa [#allocation6 + $0x1], 0  ;;  %s1130_s14 = smov 0   ;;  %s1132_s15 = smov 0  }
   0x7   :  { %s1134_s16 = smov 0   ;;  %s1136_s17 = smov 0  }
   0x8 LB: > { %s1151_s2 = sadd.s32 4294967295, %s1098_s17   ;;  %s880_s18 = sadd.s32 4294967294, %s1098_s17   ;;  %s1098_s17 = sphi %s1136_s17, %s1332_s17   ;;  %s1094_s16 = sphi %s1134_s16, %s1331_s16   ;;  %s1090_s15 = sphi %s1132_s15, %s1330_s15   ;;  %s1086_s14 = sphi %s1130_s14, %s1329_s14  }
   0x9   : > { %p41_p0 = scmp.ne.s32.totalorder %s1090_s15, %s1086_s14  ;;  %p42_p1 = scmp.eq.s32.totalorder %s1151_s2, 0 }
   0xa   : > { %p107_p2 = scmp.eq.s32.totalorder %s1151_s2, 1  ;;  %p113_p3 = scmp.eq.s32.totalorder %s880_s18, 1 }
   0xb   : > { %p1160_p4 = por %p42_p1, %p41_p0  ;;  %p881_p5 = scmp.ge.s32.totalorder %s1098_s17, 1 }
   0xc   : > { %p1165_p6 = por %p113_p3, %p41_p0  ;;  %p120_p7 = scmp.lt.s32.totalorder %s1098_s17, 3 }
   0xd   : > { %s131_s23 = sshll.u32 %s1320_s1, 4  ;;  %s1100_s25 = smov [#allocation7]   ;;  %s132_s23 = int_to_ptr.hbm [resolvable:$true] %s131_s23 }
   0xe   : > { %p1173_p8 = pnand %p881_p5, %p120_p7  ;;  %s133_s26 = sshll.u32 %s1100_s25, 4  ;;  %s134_s26 = int_to_ptr.vmem [resolvable:$true] %s133_s26 }
   0xf   : > { %s1183_s27 = sadd.s32 1, %s1098_s17   ;;  %s1101_s28 = smov 128  }
  0x10   : > { %p907_p9 = pneg %p1173_p8  ;;  %s1102_s29 = smov 8  }
  0x11   : > { %s25_s30 = ssub.s32 %s1098_s17, %s1183_s27  ;;  %s28_s4 = sadd.s32 1, %s1094_s16 }
  0x12   : > { %p908_p10 = pnand %p907_p9, %p42_p1  ;;  %p26_p12 = scmp.eq.s32.totalorder %s25_s30, 0 }
  0x13   : > { %p35_p13 = scmp.ne.s32.totalorder %s1094_s16, %s1090_s15  ;;  %p36_p0 = scmp.eq.s32.totalorder %s1098_s17, 0 }
  0x14   : > { %910 = dma.hbm_to_vmem [thread:$0]  (!%p908_p10), %s132_s23, 28672, %s134_s26, [#allocation8], %s1101_s28, %s1101_s28, %s1102_s29  }
  0x15   : > { %s1195_s5 = scalar_select %p26_p12, %s1094_s16, %s28_s4  }
  0x16   : > { %p1199_p3 = por %p107_p2, %p35_p13  ;;  %p920_p5 = scmp.lt.s32.totalorder %s1098_s17, 2 }
  0x17   : > { %s150_s7 = sand.u32 1, %s1094_s16   ;;  %s897_s8 = sshll.u32 %s1098_s17, 5 }
  0x18   : > { %p37_p7 = por %p36_p0, %p35_p13  ;;  %s884_s9 = sshll.u32 %s150_s7, 5 }
  0x19   : > { %s159_s12 = scalar_lea.hbm %s1319_s0, %s897_s8  ;;  %s154_s18 = scalar_lea.vmem [#allocation4], %s884_s9 }
  0x1a   : > { %s160_s13 = sshll.u32 %s159_s12, 4  ;;  %s162_s21 = sshll.u32 %s154_s18, 4  ;;  %s161_s13 = int_to_ptr.hbm [resolvable:$true] %s160_s13  ;;  %s163_s21 = int_to_ptr.vmem [resolvable:$true] %s162_s21 }
  0x1b   : > { %p1209_p9 = pnand %p920_p5, %p37_p7  ;;  %s151_s23 = scalar_lea.sflag [#allocation5], %s150_s7 }
  0x1c   : > { %s998_s25 = sshra.s32 %s161_s13, 4  ;;  %s1005_s8 = scalar_lea.hbm %s1319_s0, 64  ;;  %s999_s25 = int_to_ptr.hbm [resolvable:$true] %s998_s25 }
  0x1d   : > { %s1000_s26 = scalar_lea.hbm %s999_s25, 32  ;;  %p1002_p10 = pneg %p1209_p9 }
  0x1e   : > { %p1001_p2 = scmp.ne.s32.totalorder %s999_s25, %s1000_s26  ;;  %p1006_p0 = scmp.lt.s32.totalorder %s999_s25, %s1319_s0 }
  0x1f   : > { %p1007_p5 = scmp.lt.s32.totalorder %s1005_s8, %s1000_s26 }
  0x20   : > { %p1003_p12 = pnand %p1002_p10, %p1001_p2 }
  0x21   : > { %p1008_p7 = por %p1007_p5, %p1006_p0 }
  0x22   : > { %p1004_p13 = pneg %p1003_p12 }
  0x24   : > { %p1009_p11 = pnand %p1008_p7, %p1004_p13 }
  0x26   : > { %1012 = shalt.err (!%p1009_p11)
}
  0x27   : > { %914 = dma.hbm_to_vmem [thread:$0]  (!%p1209_p9), %s161_s13, 512, %s163_s21, %s151_s23, %s1101_s28, %s1101_s28, %s1102_s29  }
  0x28   : > { %174 = sbr.rel (%p1173_p8) target bundleno = 349 (0x15d), region = 32  ;;  %s1229_s7 = sand.u32 (!%p1173_p8), 1, %s1090_s15  }
  0x29   : > { %s888_s11 = sshll.u32 (!%p1173_p8), %s1229_s7, 5  ;;  %s177_s12 = scalar_lea.sflag (!%p1173_p8), [#allocation5], %s1229_s7 }
  0x2a   : > { %s1235_s18 = scalar_lea.vmem (!%p1173_p8), [#allocation4], %s888_s11 }
  0x2d   : > { %1073 = dma.done.wait (%p1160_p4), %s177_s12, 512  }
  0x2e   : > { %1075 = vsyncadd (%p1160_p4), %s177_s12, 4294966784 }
  0x2f   : > { %1077 = dma.done.wait (%p42_p1), [#allocation8], 28672  }
  0x30   : > { %1079 = vsyncadd (%p42_p1), [#allocation8], 4294938624  ;;  %v263_v0 = vld [vmem:[#allocation7 + $0x78] sm:$0xff]  ;;  %v262_v2 = vld [vmem:[#allocation7 + $0x70] sm:$0xff]  ;;  %v1103_v46 = vmov 4.0   ;;  %v1104_v49 = vmov 0.0  }
  0x31   : > { %v295_v1 = vld [vmem:[#allocation7 + $0x178] sm:$0xff]  ;;  %474 = vmatpush.msra.mxu0 %v263_v0  ;;  %v294_v4 = vld [vmem:[#allocation7 + $0x170] sm:$0xff]  ;;  %v261_v6 = vld [vmem:[#allocation7 + $0x68] sm:$0xff]  ;;  %962 = vrcp.f32 %v1103_v46  ;;  %227 = vst [vmem:[#allocation2] sm:$0xff] %v1104_v49  ;;  %s472_s19 = sld [smem:[#allocation3]]  ;;  %s898_s24 = sshll.u32 %s1151_s2, 5 }
  0x32   : > { %514 = vmatpush.msra.mxu2 %v295_v1  ;;  %v279_v3 = vld [vmem:[#allocation7 + $0xf8] sm:$0xff]  ;;  %v278_v7 = vld [vmem:[#allocation7 + $0xf0] sm:$0xff]  ;;  %v293_v8 = vld [vmem:[#allocation7 + $0x168] sm:$0xff]  ;;  %228 = vst [vmem:[#allocation2 + $0x8] sm:$0x3f] %v1104_v49  ;;  %s793_s13 = scalar_lea.hbm %s1322_s3, %s898_s24  ;;  %s208_s21 = scalar_lea.vmem [#allocation9], %s888_s11 }
  0x33   : > { %v311_v5 = vld [vmem:[#allocation7 + $0x1f8] sm:$0xff]  ;;  %494 = vmatpush.msra.mxu1 %v279_v3  ;;  %475 = vmatpush.msra.mxu0 %v262_v2  ;;  %v310_v9 = vld [vmem:[#allocation7 + $0x1f0] sm:$0xff]  ;;  %v277_v10 = vld [vmem:[#allocation7 + $0xe8] sm:$0xff]  ;;  %229 = vst [vmem:[#allocation2 + $0x10] sm:$0xff] %v1104_v49  ;;  %s794_s22 = sshll.u32 %s208_s21, 4  ;;  %s796_s23 = sshll.u32 %s793_s13, 4  ;;  %s795_s22 = int_to_ptr.vmem [resolvable:$true] %s794_s22  ;;  %s797_s23 = int_to_ptr.hbm [resolvable:$true] %s796_s23 }
  0x34   : > { %534 = vmatpush.msra.mxu3 %v311_v5  ;;  %515 = vmatpush.msra.mxu2 %v294_v4  ;;  %v260_v11 = vld [vmem:[#allocation7 + $0x60] sm:$0xff]  ;;  %v309_v13 = vld [vmem:[#allocation7 + $0x1e8] sm:$0xff]  ;;  %v259_v16 = vld [vmem:[#allocation7 + $0x58] sm:$0xff]  ;;  %230 = vst [vmem:[#allocation2 + $0x18] sm:$0x3f] %v1104_v49  ;;  %s782_s2 = scalar_lea.sflag [#allocation6], %s1229_s7 }
  0x35   : > { %495 = vmatpush.msra.mxu1 %v278_v7  ;;  %v292_v12 = vld [vmem:[#allocation7 + $0x160] sm:$0xff]  ;;  %476 = vmatpush.msra.mxu0 %v261_v6  ;;  %v291_v17 = vld [vmem:[#allocation7 + $0x158] sm:$0xff]  ;;  %v258_v20 = vld [vmem:[#allocation7 + $0x50] sm:$0xff]  ;;  %s1042_s25 = sshra.s32 %s797_s23, 4  ;;  %s1048_s8 = scalar_lea.hbm %s1322_s3, 64  ;;  %s1043_s25 = int_to_ptr.hbm [resolvable:$true] %s1042_s25 }
  0x36   : > { %535 = vmatpush.msra.mxu3 %v310_v9  ;;  %516 = vmatpush.msra.mxu2 %v293_v8  ;;  %v276_v14 = vld [vmem:[#allocation7 + $0xe0] sm:$0xff]  ;;  %v275_v18 = vld [vmem:[#allocation7 + $0xd8] sm:$0xff]  ;;  %v290_v21 = vld [vmem:[#allocation7 + $0x150] sm:$0xff]  ;;  %s1044_s26 = scalar_lea.hbm %s1043_s25, 32  ;;  %p1049_p11 = scmp.lt.s32.totalorder %s1043_s25, %s1322_s3 }
  0x37   : > { %v308_v15 = vld [vmem:[#allocation7 + $0x1e0] sm:$0xff]  ;;  %496 = vmatpush.msra.mxu1 %v277_v10  ;;  %477 = vmatpush.msra.mxu0 %v260_v11  ;;  %v307_v19 = vld [vmem:[#allocation7 + $0x1d8] sm:$0xff]  ;;  %v274_v22 = vld [vmem:[#allocation7 + $0xd0] sm:$0xff]  ;;  %v1245_v58 = vpop.eup %962  ;;  %p1045_p1 = scmp.ne.s32.totalorder %s1043_s25, %s1044_s26  ;;  %p1050_p9 = scmp.lt.s32.totalorder %s1048_s8, %s1044_s26 }
  0x38   : > { %536 = vmatpush.msra.mxu3 %v309_v13  ;;  %517 = vmatpush.msra.mxu2 %v292_v12  ;;  %v306_v23 = vld [vmem:[#allocation7 + $0x1d0] sm:$0xff]  ;;  %v257_v24 = vld [vmem:[#allocation7 + $0x48] sm:$0xff]  ;;  %v256_v28 = vld [vmem:[#allocation7 + $0x40] sm:$0xff]  ;;  %v220_v3 = vmul.f32 4.0, %v1245_v58  ;;  %vm224_vm0 = vweird.f32 %v1245_v58 }
  0x39   : > { %497 = vmatpush.msra.mxu1 %v276_v14  ;;  %478 = vmatpush.msra.mxu0 %v259_v16  ;;  %v289_v25 = vld [vmem:[#allocation7 + $0x148] sm:$0xff]  ;;  %v288_v29 = vld [vmem:[#allocation7 + $0x140] sm:$0xff]  ;;  %v255_v32 = vld [vmem:[#allocation7 + $0x38] sm:$0xff]  ;;  %p1046_p4 = pnand %p1045_p1, %p1199_p3  ;;  %p1051_p2 = por %p1050_p9, %p1049_p11 }
  0x3a   : > { %537 = vmatpush.msra.mxu3 %v308_v15  ;;  %518 = vmatpush.msra.mxu2 %v291_v17  ;;  %v273_v26 = vld [vmem:[#allocation7 + $0xc8] sm:$0xff]  ;;  %v272_v30 = vld [vmem:[#allocation7 + $0xc0] sm:$0xff]  ;;  %v287_v33 = vld [vmem:[#allocation7 + $0x138] sm:$0xff]  ;;  %v221_v12 = vsub.f32 1.0, %v220_v3 }
  0x3b   : > { %498 = vmatpush.msra.mxu1 %v275_v18  ;;  %479 = vmatpush.msra.mxu0 %v258_v20  ;;  %v305_v27 = vld [vmem:[#allocation7 + $0x1c8] sm:$0xff]  ;;  %v304_v31 = vld [vmem:[#allocation7 + $0x1c0] sm:$0xff]  ;;  %v271_v34 = vld [vmem:[#allocation7 + $0xb8] sm:$0xff]  ;;  %p1047_p8 = pneg %p1046_p4 }
  0x3c   : > { %538 = vmatpush.msra.mxu3 %v307_v19  ;;  %519 = vmatpush.msra.mxu2 %v290_v21  ;;  %v303_v35 = vld [vmem:[#allocation7 + $0x1b8] sm:$0xff]  ;;  %v254_v36 = vld [vmem:[#allocation7 + $0x30] sm:$0xff]  ;;  %v253_v40 = vld [vmem:[#allocation7 + $0x28] sm:$0xff]  ;;  %v222_v21 = vmul.f32 %v1245_v58, %v221_v12 }
  0x3d   : > { %499 = vmatpush.msra.mxu1 %v274_v22  ;;  %480 = vmatpush.msra.mxu0 %v257_v24  ;;  %v286_v37 = vld [vmem:[#allocation7 + $0x130] sm:$0xff]  ;;  %v285_v41 = vld [vmem:[#allocation7 + $0x128] sm:$0xff]  ;;  %v252_v44 = vld [vmem:[#allocation7 + $0x20] sm:$0xff]  ;;  %p1052_p10 = pnand %p1051_p2, %p1047_p8 }
  0x3e   : > { %539 = vmatpush.msra.mxu3 %v306_v23  ;;  %520 = vmatpush.msra.mxu2 %v289_v25  ;;  %v270_v38 = vld [vmem:[#allocation7 + $0xb0] sm:$0xff]  ;;  %v269_v42 = vld [vmem:[#allocation7 + $0xa8] sm:$0xff]  ;;  %v284_v45 = vld [vmem:[#allocation7 + $0x120] sm:$0xff] }
  0x3f   : > { %500 = vmatpush.msra.mxu1 %v273_v26  ;;  %481 = vmatpush.msra.mxu0 %v256_v28  ;;  %v302_v39 = vld [vmem:[#allocation7 + $0x1b0] sm:$0xff]  ;;  %v301_v43 = vld [vmem:[#allocation7 + $0x1a8] sm:$0xff]  ;;  %v268_v47 = vld [vmem:[#allocation7 + $0xa0] sm:$0xff] }
  0x40   : > { %540 = vmatpush.msra.mxu3 %v305_v27  ;;  %521 = vmatpush.msra.mxu2 %v288_v29  ;;  %v300_v48 = vld [vmem:[#allocation7 + $0x1a0] sm:$0xff]  ;;  %v251_v50 = vld [vmem:[#allocation7 + $0x18] sm:$0xff]  ;;  %v250_v54 = vld [vmem:[#allocation7 + $0x10] sm:$0xff] }
  0x41   : > { %501 = vmatpush.msra.mxu1 %v272_v30  ;;  %482 = vmatpush.msra.mxu0 %v255_v32  ;;  %v283_v51 = vld [vmem:[#allocation7 + $0x118] sm:$0xff]  ;;  %v282_v55 = vld [vmem:[#allocation7 + $0x110] sm:$0xff]  ;;  %v249_v59 = vld [vmem:[#allocation7 + $0x8] sm:$0xff] }
  0x42   : > { %541 = vmatpush.msra.mxu3 %v304_v31  ;;  %522 = vmatpush.msra.mxu2 %v287_v33  ;;  %v267_v52 = vld [vmem:[#allocation7 + $0x98] sm:$0xff]  ;;  %v266_v56 = vld [vmem:[#allocation7 + $0x90] sm:$0xff]  ;;  %v281_v60 = vld [vmem:[#allocation7 + $0x108] sm:$0xff] }
  0x43   : > { %502 = vmatpush.msra.mxu1 %v271_v34  ;;  %483 = vmatpush.msra.mxu0 %v254_v36  ;;  %v299_v53 = vld [vmem:[#allocation7 + $0x198] sm:$0xff]  ;;  %v298_v57 = vld [vmem:[#allocation7 + $0x190] sm:$0xff]  ;;  %v265_v61 = vld [vmem:[#allocation7 + $0x88] sm:$0xff]  ;;  %v223_v34 = vadd.f32 %v1245_v58, %v222_v21 }
  0x44   : > { %542 = vmatpush.msra.mxu3 %v303_v35  ;;  %523 = vmatpush.msra.mxu2 %v286_v37  ;;  %v297_v62 = vld [vmem:[#allocation7 + $0x188] sm:$0xff]  ;;  %v248_v63 = vld [vmem:[#allocation7] sm:$0xff]  ;;  %v327_v1 = vld [vmem:[#allocation7 + $0x278] sm:$0xff] }
  0x45   : > { %503 = vmatpush.msra.mxu1 %v270_v38  ;;  %484 = vmatpush.msra.mxu0 %v253_v40  ;;  %v280_v0 = vld [vmem:[#allocation7 + $0x100] sm:$0xff]  ;;  %v359_v2 = vld [vmem:[#allocation7 + $0x378] sm:$0xff]  ;;  %v326_v6 = vld [vmem:[#allocation7 + $0x270] sm:$0xff] }
  0x46   : > { %543 = vmatpush.msra.mxu3 %v302_v39  ;;  %524 = vmatpush.msra.mxu2 %v285_v41  ;;  %v264_v4 = vld [vmem:[#allocation7 + $0x80] sm:$0xff]  ;;  %v343_v7 = vld [vmem:[#allocation7 + $0x2f8] sm:$0xff]  ;;  %v358_v8 = vld [vmem:[#allocation7 + $0x370] sm:$0xff] }
  0x47   : > { %504 = vmatpush.msra.mxu1 %v269_v42  ;;  %485 = vmatpush.msra.mxu0 %v252_v44  ;;  %v296_v5 = vld [vmem:[#allocation7 + $0x180] sm:$0xff]  ;;  %v375_v9 = vld [vmem:[#allocation7 + $0x3f8] sm:$0xff]  ;;  %v325_v10 = vld [vmem:[#allocation7 + $0x268] sm:$0xff] }
  0x48   : > { %544 = vmatpush.msra.mxu3 %v301_v43  ;;  %525 = vmatpush.msra.mxu2 %v284_v45  ;;  %v342_v11 = vld [vmem:[#allocation7 + $0x2f0] sm:$0xff]  ;;  %v357_v13 = vld [vmem:[#allocation7 + $0x368] sm:$0xff]  ;;  %v324_v15 = vld [vmem:[#allocation7 + $0x260] sm:$0xff] }
  0x49   : > { %505 = vmatpush.msra.mxu1 %v268_v47  ;;  %486 = vmatpush.msra.mxu0 %v251_v50  ;;  %v374_v14 = vld [vmem:[#allocation7 + $0x3f0] sm:$0xff]  ;;  %v341_v16 = vld [vmem:[#allocation7 + $0x2e8] sm:$0xff]  ;;  %v356_v17 = vld [vmem:[#allocation7 + $0x360] sm:$0xff] }
  0x4a   : > { %545 = vmatpush.msra.mxu3 %v300_v48  ;;  %526 = vmatpush.msra.mxu2 %v283_v51  ;;  %v373_v18 = vld [vmem:[#allocation7 + $0x3e8] sm:$0xff]  ;;  %v323_v19 = vld [vmem:[#allocation7 + $0x258] sm:$0xff]  ;;  %v340_v20 = vld [vmem:[#allocation7 + $0x2e0] sm:$0xff]  ;;  %v225_v48 = vsel %vm224_vm0, %v1245_v58, %v223_v34 }
  0x4b   : > { %506 = vmatpush.msra.mxu1 %v267_v52  ;;  %487 = vmatpush.msra.mxu0 %v250_v54  ;;  %v355_v22 = vld [vmem:[#allocation7 + $0x358] sm:$0xff]  ;;  %v372_v23 = vld [vmem:[#allocation7 + $0x3e0] sm:$0xff]  ;;  %v322_v24 = vld [vmem:[#allocation7 + $0x250] sm:$0xff] }
  0x4c   : > { %546 = vmatpush.msra.mxu3 %v299_v53  ;;  %527 = vmatpush.msra.mxu2 %v282_v55  ;;  %v339_v25 = vld [vmem:[#allocation7 + $0x2d8] sm:$0xff]  ;;  %v354_v26 = vld [vmem:[#allocation7 + $0x350] sm:$0xff]  ;;  %v321_v28 = vld [vmem:[#allocation7 + $0x248] sm:$0xff] }
  0x4d   : > { %507 = vmatpush.msra.mxu1 %v266_v56  ;;  %488 = vmatpush.msra.mxu0 %v249_v59  ;;  %v371_v27 = vld [vmem:[#allocation7 + $0x3d8] sm:$0xff]  ;;  %v338_v29 = vld [vmem:[#allocation7 + $0x2d0] sm:$0xff]  ;;  %v1250_v30 = vld [vmem:[%s1235_s18] sm:$0xff] }
  0x4e   : > { %547 = vmatpush.msra.mxu3 %v298_v57  ;;  %528 = vmatpush.msra.mxu2 %v281_v60  ;;  %v1253_v31 = vld [vmem:[%s1235_s18 + $0x8] sm:$0xff]  ;;  %v1256_v32 = vld [vmem:[%s1235_s18 + $0x10] sm:$0xff]  ;;  %v1259_v33 = vld [vmem:[%s1235_s18 + $0x18] sm:$0xff] }
  0x4f   : > { %508 = vmatpush.msra.mxu1 %v265_v61  ;;  %489 = vmatpush.msra.mxu0 %v248_v63  ;;  %v353_v35 = vld [vmem:[#allocation7 + $0x348] sm:$0xff]  ;;  %v370_v36 = vld [vmem:[#allocation7 + $0x3d0] sm:$0xff]  ;;  %v213_v37 = vmax.f32 %v1250_v30, %v1253_v31  ;;  %v214_v38 = vmax.f32 %v1256_v32, %v1259_v33  ;;  %v216_v39 = vadd.f32 %v1253_v31, %v1250_v30  ;;  %v320_v40 = vld [vmem:[#allocation7 + $0x240] sm:$0xff] }
  0x50   : > { %548 = vmatpush.msra.mxu3 %v297_v62  ;;  %529 = vmatpush.msra.mxu2 %v280_v0  ;;  %v337_v41 = vld [vmem:[#allocation7 + $0x2c8] sm:$0xff]  ;;  %v352_v42 = vld [vmem:[#allocation7 + $0x340] sm:$0xff]  ;;  %v319_v46 = vld [vmem:[#allocation7 + $0x238] sm:$0xff] }
  0x51   : > { %554 = vmatpush.msrb.mxu0 %v327_v1  ;;  %509 = vmatpush.msra.mxu1 %v264_v4  ;;  %v369_v43 = vld [vmem:[#allocation7 + $0x3c8] sm:$0xff]  ;;  %v1269_v44 = vmax.f32 %v213_v37, %v214_v38  ;;  %v217_v45 = vadd.f32 %v216_v39, %v1256_v32  ;;  %v336_v47 = vld [vmem:[#allocation7 + $0x2c0] sm:$0xff]  ;;  %v351_v49 = vld [vmem:[#allocation7 + $0x338] sm:$0xff] }
  0x52   : > { %594 = vmatpush.msrb.mxu2 %v359_v2  ;;  %549 = vmatpush.msra.mxu3 %v296_v5  ;;  %v368_v50 = vld [vmem:[#allocation7 + $0x3c0] sm:$0xff]  ;;  %v318_v52 = vld [vmem:[#allocation7 + $0x230] sm:$0xff]  ;;  %v335_v53 = vld [vmem:[#allocation7 + $0x2b8] sm:$0xff] }
  0x53   : > { %555 = vmatpush.msrb.mxu0 %v326_v6  ;;  %574 = vmatpush.msrb.mxu1 %v343_v7  ;;  %231 = vst [vmem:[#allocation2 + $0x3] sm:$0xff] %v1269_v44  ;;  %v218_v51 = vadd.f32 %v217_v45, %v1259_v33  ;;  %v350_v54 = vld [vmem:[#allocation7 + $0x330] sm:$0xff]  ;;  %v367_v55 = vld [vmem:[#allocation7 + $0x3b8] sm:$0xff]  ;;  %v317_v57 = vld [vmem:[#allocation7 + $0x228] sm:$0xff] }
  0x54   : > { %595 = vmatpush.msrb.mxu2 %v358_v8  ;;  %614 = vmatpush.msrb.mxu3 %v375_v9  ;;  %v334_v58 = vld [vmem:[#allocation7 + $0x2b0] sm:$0xff]  ;;  %v349_v59 = vld [vmem:[#allocation7 + $0x328] sm:$0xff]  ;;  %v316_v61 = vld [vmem:[#allocation7 + $0x220] sm:$0xff] }
  0x55   : > { %556 = vmatpush.msrb.mxu0 %v325_v10  ;;  %575 = vmatpush.msrb.mxu1 %v342_v11  ;;  %v1275_v56 = vmul.f32 %v225_v48, %v218_v51  ;;  %v366_v60 = vld [vmem:[#allocation7 + $0x3b0] sm:$0xff]  ;;  %v333_v62 = vld [vmem:[#allocation7 + $0x2a8] sm:$0xff]  ;;  %v348_v63 = vld [vmem:[#allocation7 + $0x320] sm:$0xff] }
  0x56   : > { %596 = vmatpush.msrb.mxu2 %v357_v13  ;;  %615 = vmatpush.msrb.mxu3 %v374_v14  ;;  %v365_v0 = vld [vmem:[#allocation7 + $0x3a8] sm:$0xff]  ;;  %v315_v1 = vld [vmem:[#allocation7 + $0x218] sm:$0xff]  ;;  %v332_v2 = vld [vmem:[#allocation7 + $0x2a0] sm:$0xff] }
  0x57   : > { %557 = vmatpush.msrb.mxu0 %v324_v15  ;;  %576 = vmatpush.msrb.mxu1 %v341_v16  ;;  %233 = vst [vmem:[#allocation2 + $0x13] sm:$0xff] %v1275_v56  ;;  %v347_v3 = vld [vmem:[#allocation7 + $0x318] sm:$0xff]  ;;  %v364_v4 = vld [vmem:[#allocation7 + $0x3a0] sm:$0xff]  ;;  %v314_v5 = vld [vmem:[#allocation7 + $0x210] sm:$0xff] }
  0x58   : > { %597 = vmatpush.msrb.mxu2 %v356_v17  ;;  %616 = vmatpush.msrb.mxu3 %v373_v18  ;;  %v331_v6 = vld [vmem:[#allocation7 + $0x298] sm:$0xff]  ;;  %v346_v7 = vld [vmem:[#allocation7 + $0x310] sm:$0xff]  ;;  %v313_v9 = vld [vmem:[#allocation7 + $0x208] sm:$0xff] }
  0x59   : > { %558 = vmatpush.msrb.mxu0 %v323_v19  ;;  %577 = vmatpush.msrb.mxu1 %v340_v20  ;;  %v363_v8 = vld [vmem:[#allocation7 + $0x398] sm:$0xff]  ;;  %v330_v10 = vld [vmem:[#allocation7 + $0x290] sm:$0xff]  ;;  %v345_v11 = vld [vmem:[#allocation7 + $0x308] sm:$0xff] }
  0x5a   : > { %598 = vmatpush.msrb.mxu2 %v355_v22  ;;  %617 = vmatpush.msrb.mxu3 %v372_v23  ;;  %v362_v12 = vld [vmem:[#allocation7 + $0x390] sm:$0xff]  ;;  %v236_v13 = vld [vmem:[#allocation2 + $0x2] sm:$0xff]  ;;  %v391_v19 = vld [vmem:[#allocation7 + $0x478] sm:$0xff] }
  0x5b   : > { %559 = vmatpush.msrb.mxu0 %v322_v24  ;;  %578 = vmatpush.msrb.mxu1 %v339_v25  ;;  %v312_v14 = vld [vmem:[#allocation7 + $0x200] sm:$0xff]  ;;  %v329_v15 = vld [vmem:[#allocation7 + $0x288] sm:$0xff]  ;;  %v423_v20 = vld [vmem:[#allocation7 + $0x578] sm:$0xff] }
  0x5c   : > { %599 = vmatpush.msrb.mxu2 %v354_v26  ;;  %618 = vmatpush.msrb.mxu3 %v371_v27  ;;  %v344_v16 = vld [vmem:[#allocation7 + $0x300] sm:$0xff]  ;;  %v361_v17 = vld [vmem:[#allocation7 + $0x388] sm:$0xff]  ;;  %v390_v24 = vld [vmem:[#allocation7 + $0x470] sm:$0xff] }
  0x5d   : > { %560 = vmatpush.msrb.mxu0 %v321_v28  ;;  %579 = vmatpush.msrb.mxu1 %v338_v29  ;;  %v234_v18 = vld [vmem:[#allocation2] sm:$0xff]  ;;  %v407_v25 = vld [vmem:[#allocation7 + $0x4f8] sm:$0xff]  ;;  %v422_v26 = vld [vmem:[#allocation7 + $0x570] sm:$0xff] }
  0x5e   : > { %600 = vmatpush.msrb.mxu2 %v353_v35  ;;  %619 = vmatpush.msrb.mxu3 %v370_v36  ;;  %v328_v21 = vld [vmem:[#allocation7 + $0x280] sm:$0xff]  ;;  %v439_v27 = vld [vmem:[#allocation7 + $0x5f8] sm:$0xff]  ;;  %v389_v28 = vld [vmem:[#allocation7 + $0x468] sm:$0xff] }
  0x5f   : > { %561 = vmatpush.msrb.mxu0 %v320_v40  ;;  %580 = vmatpush.msrb.mxu1 %v337_v41  ;;  %v360_v22 = vld [vmem:[#allocation7 + $0x380] sm:$0xff]  ;;  %v406_v29 = vld [vmem:[#allocation7 + $0x4f0] sm:$0xff]  ;;  %v421_v34 = vld [vmem:[#allocation7 + $0x568] sm:$0xff] }
  0x60   : > { %601 = vmatpush.msrb.mxu2 %v352_v42  ;;  %620 = vmatpush.msrb.mxu3 %v369_v43  ;;  %v235_v23 = vld [vmem:[#allocation2 + $0x1] sm:$0xff]  ;;  %v438_v35 = vld [vmem:[#allocation7 + $0x5f0] sm:$0xff]  ;;  %v387_v43 = vld [vmem:[#allocation7 + $0x458] sm:$0xff] }
  0x61   : > { %562 = vmatpush.msrb.mxu0 %v319_v46  ;;  %581 = vmatpush.msrb.mxu1 %v336_v47  ;;  %v240_v36 = vld [vmem:[#allocation2 + $0x6] sm:$0xff]  ;;  %v241_v42 = vld [vmem:[#allocation2 + $0x10] sm:$0xff]  ;;  %v419_v45 = vld [vmem:[#allocation7 + $0x558] sm:$0xff] }
  0x62   : > { %602 = vmatpush.msrb.mxu2 %v351_v49  ;;  %621 = vmatpush.msrb.mxu3 %v368_v50  ;;  %v388_v37 = vld [vmem:[#allocation7 + $0x460] sm:$0xff]  ;;  %v405_v38 = vld [vmem:[#allocation7 + $0x4e8] sm:$0xff]  ;;  %v386_v48 = vld [vmem:[#allocation7 + $0x450] sm:$0xff] }
  0x63   : > { %563 = vmatpush.msrb.mxu0 %v318_v52  ;;  %582 = vmatpush.msrb.mxu1 %v335_v53  ;;  %v420_v39 = vld [vmem:[#allocation7 + $0x560] sm:$0xff]  ;;  %v437_v40 = vld [vmem:[#allocation7 + $0x5e8] sm:$0xff]  ;;  %v403_v49 = vld [vmem:[#allocation7 + $0x4d8] sm:$0xff] }
  0x64   : > { %603 = vmatpush.msrb.mxu2 %v350_v54  ;;  %622 = vmatpush.msrb.mxu3 %v367_v55  ;;  %v238_v41 = vld [vmem:[#allocation2 + $0x4] sm:$0xff]  ;;  %v418_v50 = vld [vmem:[#allocation7 + $0x550] sm:$0xff]  ;;  %v435_v51 = vld [vmem:[#allocation7 + $0x5d8] sm:$0xff] }
  0x65   : > { %564 = vmatpush.msrb.mxu0 %v317_v57  ;;  %583 = vmatpush.msrb.mxu1 %v334_v58  ;;  %v436_v46 = vld [vmem:[#allocation7 + $0x5e0] sm:$0xff]  ;;  %v385_v52 = vld [vmem:[#allocation7 + $0x448] sm:$0xff]  ;;  %v402_v53 = vld [vmem:[#allocation7 + $0x4d0] sm:$0xff] }
  0x66   : > { %604 = vmatpush.msrb.mxu2 %v349_v59  ;;  %623 = vmatpush.msrb.mxu3 %v366_v60  ;;  %v239_v47 = vld [vmem:[#allocation2 + $0x5] sm:$0xff]  ;;  %v434_v55 = vld [vmem:[#allocation7 + $0x5d0] sm:$0xff] }
  0x67   : > { %565 = vmatpush.msrb.mxu0 %v316_v61  ;;  %584 = vmatpush.msrb.mxu1 %v333_v62  ;;  %v417_v54 = vld [vmem:[#allocation7 + $0x548] sm:$0xff]  ;;  %v384_v57 = vld [vmem:[#allocation7 + $0x440] sm:$0xff]  ;;  %v383_v61 = vld [vmem:[#allocation7 + $0x438] sm:$0xff] }
  0x68   : > { %605 = vmatpush.msrb.mxu2 %v348_v63  ;;  %624 = vmatpush.msrb.mxu3 %v365_v0  ;;  %v401_v58 = vld [vmem:[#allocation7 + $0x4c8] sm:$0xff]  ;;  %v416_v59 = vld [vmem:[#allocation7 + $0x540] sm:$0xff]  ;;  %v415_v63 = vld [vmem:[#allocation7 + $0x538] sm:$0xff] }
  0x69   : > { %566 = vmatpush.msrb.mxu0 %v315_v1  ;;  %585 = vmatpush.msrb.mxu1 %v332_v2  ;;  %v433_v60 = vld [vmem:[#allocation7 + $0x5c8] sm:$0xff]  ;;  %v400_v62 = vld [vmem:[#allocation7 + $0x4c0] sm:$0xff]  ;;  %v382_v1 = vld [vmem:[#allocation7 + $0x430] sm:$0xff] }
  0x6a   : > { %606 = vmatpush.msrb.mxu2 %v347_v3  ;;  %625 = vmatpush.msrb.mxu3 %v364_v4  ;;  %v432_v0 = vld [vmem:[#allocation7 + $0x5c0] sm:$0xff]  ;;  %v399_v2 = vld [vmem:[#allocation7 + $0x4b8] sm:$0xff]  ;;  %v414_v3 = vld [vmem:[#allocation7 + $0x530] sm:$0xff] }
  0x6b   : > { %567 = vmatpush.msrb.mxu0 %v314_v5  ;;  %586 = vmatpush.msrb.mxu1 %v331_v6  ;;  %v431_v4 = vld [vmem:[#allocation7 + $0x5b8] sm:$0xff]  ;;  %v381_v5 = vld [vmem:[#allocation7 + $0x428] sm:$0xff]  ;;  %v398_v6 = vld [vmem:[#allocation7 + $0x4b0] sm:$0xff] }
  0x6c   : > { %607 = vmatpush.msrb.mxu2 %v346_v7  ;;  %626 = vmatpush.msrb.mxu3 %v363_v8  ;;  %v413_v7 = vld [vmem:[#allocation7 + $0x528] sm:$0xff]  ;;  %v430_v8 = vld [vmem:[#allocation7 + $0x5b0] sm:$0xff] }
  0x6d   : > { %568 = vmatpush.msrb.mxu0 %v313_v9  ;;  %587 = vmatpush.msrb.mxu1 %v330_v10  ;;  %v380_v9 = vld [vmem:[#allocation7 + $0x420] sm:$0xff]  ;;  %v397_v10 = vld [vmem:[#allocation7 + $0x4a8] sm:$0xff] }
  0x6e   : > { %608 = vmatpush.msrb.mxu2 %v345_v11  ;;  %627 = vmatpush.msrb.mxu3 %v362_v12  ;;  %v412_v11 = vld [vmem:[#allocation7 + $0x520] sm:$0xff]  ;;  %v429_v12 = vld [vmem:[#allocation7 + $0x5a8] sm:$0xff] }
  0x6f   : > { %530 = vmatmul.f32.vlgmr.msra.gmra.mxu2 %v236_v13  ;;  %569 = vmatpush.msrb.mxu0 %v312_v14  ;;  %v379_v13 = vld [vmem:[#allocation7 + $0x418] sm:$0xff]  ;;  %v396_v14 = vld [vmem:[#allocation7 + $0x4a0] sm:$0xff] }
  0x70   : > { %588 = vmatpush.msrb.mxu1 %v329_v15  ;;  %609 = vmatpush.msrb.mxu2 %v344_v16  ;;  %v411_v15 = vld [vmem:[#allocation7 + $0x518] sm:$0xff]  ;;  %v428_v16 = vld [vmem:[#allocation7 + $0x5a0] sm:$0xff] }
  0x71   : > { %628 = vmatpush.msrb.mxu3 %v361_v17  ;;  %490 = vmatmul.f32.vlgmr.msra.gmra.mxu0 %v234_v18  ;;  %v378_v17 = vld [vmem:[#allocation7 + $0x410] sm:$0xff]  ;;  %v395_v18 = vld [vmem:[#allocation7 + $0x498] sm:$0xff] }
  0x72   : > { %550 = vmatmul.f32.vlgmr.msra.gmra.mxu3 %v1269_v44  ;;  %634 = vmatpush.msra.mxu0 %v391_v19  ;;  %v404_v44 = vld [vmem:[#allocation7 + $0x4e0] sm:$0xff]  ;;  %v410_v19 = vld [vmem:[#allocation7 + $0x510] sm:$0xff] }
  0x73   : > { %674 = vmatpush.msra.mxu2 %v423_v20  ;;  %589 = vmatpush.msrb.mxu1 %v328_v21  ;;  %v427_v20 = vld [vmem:[#allocation7 + $0x598] sm:$0xff]  ;;  %v377_v21 = vld [vmem:[#allocation7 + $0x408] sm:$0xff] }
  0x74   : > { %629 = vmatpush.msrb.mxu3 %v360_v22  ;;  %510 = vmatmul.f32.vlgmr.msra.gmra.mxu1 %v235_v23  ;;  %v394_v22 = vld [vmem:[#allocation7 + $0x490] sm:$0xff]  ;;  %v409_v23 = vld [vmem:[#allocation7 + $0x508] sm:$0xff] }
  0x75   : > { %635 = vmatpush.msra.mxu0 %v390_v24  ;;  %654 = vmatpush.msra.mxu1 %v407_v25  ;;  %v426_v24 = vld [vmem:[#allocation7 + $0x590] sm:$0xff]  ;;  %v376_v25 = vld [vmem:[#allocation7 + $0x400] sm:$0xff] }
  0x76   : > { %675 = vmatpush.msra.mxu2 %v422_v26  ;;  %694 = vmatpush.msra.mxu3 %v439_v27  ;;  %v393_v26 = vld [vmem:[#allocation7 + $0x488] sm:$0xff]  ;;  %v408_v27 = vld [vmem:[#allocation7 + $0x500] sm:$0xff] }
  0x77   : > { %636 = vmatpush.msra.mxu0 %v389_v28  ;;  %655 = vmatpush.msra.mxu1 %v406_v29  ;;  %v425_v28 = vld [vmem:[#allocation7 + $0x588] sm:$0xff]  ;;  %v242_v29 = vld [vmem:[#allocation2 + $0x11] sm:$0xff] }
  0x78   : > { %676 = vmatpush.msra.mxu2 %v421_v34  ;;  %695 = vmatpush.msra.mxu3 %v438_v35  ;;  %v455_v34 = vld [vmem:[#allocation7 + $0x678] sm:$0xff]  ;;  %v392_v35 = vld [vmem:[#allocation7 + $0x480] sm:$0xff] }
  0x79   : > { %610 = vmatmul.f32.vlgmr.msrb.gmra.mxu2 %v240_v36  ;;  %637 = vmatpush.msra.mxu0 %v388_v37  ;;  %v424_v36 = vld [vmem:[#allocation7 + $0x580] sm:$0xff]  ;;  %v243_v37 = vld [vmem:[#allocation2 + $0x12] sm:$0xff] }
  0x7a   : > { %656 = vmatpush.msra.mxu1 %v405_v38  ;;  %677 = vmatpush.msra.mxu2 %v420_v39  ;;  %v245_v38 = vld [vmem:[#allocation2 + $0x14] sm:$0xff] }
  0x7b   : > { %696 = vmatpush.msra.mxu3 %v437_v40  ;;  %570 = vmatmul.f32.vlgmr.msrb.gmra.mxu0 %v238_v41  ;;  %v454_v39 = vld [vmem:[#allocation7 + $0x670] sm:$0xff]  ;;  %v471_v40 = vld [vmem:[#allocation7 + $0x6f8] sm:$0xff]  ;;  %v453_v41 = vld [vmem:[#allocation7 + $0x668] sm:$0xff] }
  0x7c   : > { %630 = vmatmul.f32.vlgmr.msrb.gmra.mxu3 %v241_v42  ;;  %638 = vmatpush.msra.mxu0 %v387_v43  ;;  %v470_v42 = vld [vmem:[#allocation7 + $0x6f0] sm:$0xff]  ;;  %v452_v43 = vld [vmem:[#allocation7 + $0x660] sm:$0xff] }
  0x7d   : > { %657 = vmatpush.msra.mxu1 %v404_v44  ;;  %678 = vmatpush.msra.mxu2 %v419_v45  ;;  %v469_v44 = vld [vmem:[#allocation7 + $0x6e8] sm:$0xff]  ;;  %v451_v45 = vld [vmem:[#allocation7 + $0x658] sm:$0xff] }
  0x7e   : > { %697 = vmatpush.msra.mxu3 %v436_v46  ;;  %590 = vmatmul.f32.vlgmr.msrb.gmra.mxu1 %v239_v47  ;;  %v468_v46 = vld [vmem:[#allocation7 + $0x6e0] sm:$0xff]  ;;  %v467_v47 = vld [vmem:[#allocation7 + $0x6d8] sm:$0xff] }
  0x7f   : > { %639 = vmatpush.msra.mxu0 %v386_v48  ;;  %658 = vmatpush.msra.mxu1 %v403_v49  ;;  %v449_v48 = vld [vmem:[#allocation7 + $0x648] sm:$0xff]  ;;  %v466_v49 = vld [vmem:[#allocation7 + $0x6d0] sm:$0xff] }
  0x80   : > { %679 = vmatpush.msra.mxu2 %v418_v50  ;;  %698 = vmatpush.msra.mxu3 %v435_v51  ;;  %v448_v50 = vld [vmem:[#allocation7 + $0x640] sm:$0xff]  ;;  %v465_v51 = vld [vmem:[#allocation7 + $0x6c8] sm:$0xff] }
  0x81   : > { %640 = vmatpush.msra.mxu0 %v385_v52  ;;  %659 = vmatpush.msra.mxu1 %v402_v53  ;;  %v447_v52 = vld [vmem:[#allocation7 + $0x638] sm:$0xff]  ;;  %v464_v53 = vld [vmem:[#allocation7 + $0x6c0] sm:$0xff] }
  0x82   : > { %680 = vmatpush.msra.mxu2 %v417_v54  ;;  %699 = vmatpush.msra.mxu3 %v434_v55  ;;  %v446_v54 = vld [vmem:[#allocation7 + $0x630] sm:$0xff]  ;;  %v463_v55 = vld [vmem:[#allocation7 + $0x6b8] sm:$0xff] }
  0x83   : > { %641 = vmatpush.msra.mxu0 %v384_v57  ;;  %660 = vmatpush.msra.mxu1 %v401_v58  ;;  %v445_v57 = vld [vmem:[#allocation7 + $0x628] sm:$0xff]  ;;  %v462_v58 = vld [vmem:[#allocation7 + $0x6b0] sm:$0xff] }
  0x84   : > { %681 = vmatpush.msra.mxu2 %v416_v59  ;;  %700 = vmatpush.msra.mxu3 %v433_v60  ;;  %v444_v59 = vld [vmem:[#allocation7 + $0x620] sm:$0xff]  ;;  %v461_v60 = vld [vmem:[#allocation7 + $0x6a8] sm:$0xff] }
  0x85   : > { %642 = vmatpush.msra.mxu0 %v383_v61  ;;  %661 = vmatpush.msra.mxu1 %v400_v62  ;;  %v443_v61 = vld [vmem:[#allocation7 + $0x618] sm:$0xff]  ;;  %v460_v62 = vld [vmem:[#allocation7 + $0x6a0] sm:$0xff] }
  0x86   : > { %682 = vmatpush.msra.mxu2 %v415_v63  ;;  %701 = vmatpush.msra.mxu3 %v432_v0  ;;  %v442_v63 = vld [vmem:[#allocation7 + $0x610] sm:$0xff]  ;;  %v459_v0 = vld [vmem:[#allocation7 + $0x698] sm:$0xff] }
  0x87   : > { %643 = vmatpush.msra.mxu0 %v382_v1  ;;  %662 = vmatpush.msra.mxu1 %v399_v2  ;;  %v441_v1 = vld [vmem:[#allocation7 + $0x608] sm:$0xff]  ;;  %v458_v2 = vld [vmem:[#allocation7 + $0x690] sm:$0xff] }
  0x88   : > { %683 = vmatpush.msra.mxu2 %v414_v3  ;;  %702 = vmatpush.msra.mxu3 %v431_v4  ;;  %v440_v3 = vld [vmem:[#allocation7 + $0x600] sm:$0xff]  ;;  %v457_v4 = vld [vmem:[#allocation7 + $0x688] sm:$0xff] }
  0x89   : > { %644 = vmatpush.msra.mxu0 %v381_v5  ;;  %663 = vmatpush.msra.mxu1 %v398_v6  ;;  %v246_v5 = vld [vmem:[#allocation2 + $0x15] sm:$0xff]  ;;  %v456_v6 = vld [vmem:[#allocation7 + $0x680] sm:$0xff] }
  0x8a   : > { %684 = vmatpush.msra.mxu2 %v413_v7  ;;  %703 = vmatpush.msra.mxu3 %v430_v8  ;;  %v247_v7 = vld [vmem:[#allocation2 + $0x16] sm:$0xff]  ;;  %v473_v8 = vstv %s472_s19 }
  0x8b   : > { %645 = vmatpush.msra.mxu0 %v380_v9  ;;  %664 = vmatpush.msra.mxu1 %v397_v10 }
  0x8c   : > { %685 = vmatpush.msra.mxu2 %v412_v11  ;;  %704 = vmatpush.msra.mxu3 %v429_v12 }
  0x8d   : > { %646 = vmatpush.msra.mxu0 %v379_v13  ;;  %665 = vmatpush.msra.mxu1 %v396_v14 }
  0x8e   : > { %686 = vmatpush.msra.mxu2 %v411_v15  ;;  %705 = vmatpush.msra.mxu3 %v428_v16 }
  0x8f   : > { %647 = vmatpush.msra.mxu0 %v378_v17  ;;  %666 = vmatpush.msra.mxu1 %v395_v18 }
  0x90   : > { %687 = vmatpush.msra.mxu2 %v410_v19  ;;  %706 = vmatpush.msra.mxu3 %v427_v20 }
  0x91   : > { %648 = vmatpush.msra.mxu0 %v377_v21  ;;  %667 = vmatpush.msra.mxu1 %v394_v22 }
  0x92   : > { %688 = vmatpush.msra.mxu2 %v409_v23  ;;  %707 = vmatpush.msra.mxu3 %v426_v24 }
  0x93   : > { %649 = vmatpush.msra.mxu0 %v376_v25  ;;  %668 = vmatpush.msra.mxu1 %v393_v26 }
  0x94   : > { %689 = vmatpush.msra.mxu2 %v408_v27  ;;  %708 = vmatpush.msra.mxu3 %v425_v28 }
  0x95   : > { %650 = vmatmul.f32.vlgmr.msra.gmra.mxu0 %v242_v29  ;;  %690 = vmatmul.f32.vlgmr.msra.gmra.mxu2 %v1275_v56  ;;  %v450_v56 = vld [vmem:[#allocation7 + $0x650] sm:$0xff] }
  0x96   : > { %714 = vmatpush.msrb.mxu0 %v455_v34  ;;  %669 = vmatpush.msra.mxu1 %v392_v35 }
  0x97   : > { %709 = vmatpush.msra.mxu3 %v424_v36  ;;  %670 = vmatmul.f32.vlgmr.msra.gmra.mxu1 %v243_v37 }
  0x98   : > { %710 = vmatmul.f32.vlgmr.msra.gmra.mxu3 %v245_v38  ;;  %715 = vmatpush.msrb.mxu0 %v454_v39 }
  0x99   : > { %734 = vmatpush.msrb.mxu1 %v471_v40 }
  0x9a   : > { %716 = vmatpush.msrb.mxu0 %v453_v41 }
  0x9b   : > { %735 = vmatpush.msrb.mxu1 %v470_v42 }
  0x9c   : > { %717 = vmatpush.msrb.mxu0 %v452_v43 }
  0x9d   : > { %736 = vmatpush.msrb.mxu1 %v469_v44 }
  0x9e   : > { %718 = vmatpush.msrb.mxu0 %v451_v45 }
  0x9f   : > { %737 = vmatpush.msrb.mxu1 %v468_v46 }
  0xa0   : > { %719 = vmatpush.msrb.mxu0 %v450_v56 }
  0xa1   : > { %738 = vmatpush.msrb.mxu1 %v467_v47 }
  0xa2   : > { %720 = vmatpush.msrb.mxu0 %v449_v48 }
  0xa3   : > { %739 = vmatpush.msrb.mxu1 %v466_v49 }
  0xa4   : > { %721 = vmatpush.msrb.mxu0 %v448_v50 }
  0xa5   : > { %740 = vmatpush.msrb.mxu1 %v465_v51 }
  0xa6   : > { %722 = vmatpush.msrb.mxu0 %v447_v52 }
  0xa7   : > { %741 = vmatpush.msrb.mxu1 %v464_v53 }
  0xa8   : > { %723 = vmatpush.msrb.mxu0 %v446_v54 }
  0xa9   : > { %742 = vmatpush.msrb.mxu1 %v463_v55 }
  0xaa   : > { %724 = vmatpush.msrb.mxu0 %v445_v57 }
  0xab   : > { %743 = vmatpush.msrb.mxu1 %v462_v58 }
  0xac   : > { %725 = vmatpush.msrb.mxu0 %v444_v59 }
  0xad   : > { %744 = vmatpush.msrb.mxu1 %v461_v60 }
  0xae   : > { %726 = vmatpush.msrb.mxu0 %v443_v61 }
  0xaf   : > { %745 = vmatpush.msrb.mxu1 %v460_v62 }
  0xb0   : > { %727 = vmatpush.msrb.mxu0 %v442_v63 }
  0xb1   : > { %746 = vmatpush.msrb.mxu1 %v459_v0 }
  0xb2   : > { %728 = vmatpush.msrb.mxu0 %v441_v1 }
  0xb3   : > { %747 = vmatpush.msrb.mxu1 %v458_v2 }
  0xb4   : > { %729 = vmatpush.msrb.mxu0 %v440_v3 }
  0xb5   : > { %748 = vmatpush.msrb.mxu1 %v457_v4  ;;  %730 = vmatmul.f32.vlgmr.msrb.gmra.mxu0 %v246_v5 }
  0xb7   : > { %749 = vmatpush.msrb.mxu1 %v456_v6 }
  0xb8   : > { %750 = vmatmul.f32.vlgmr.msrb.gmra.mxu1 %v247_v7 }
  0xee   : > { %v491_v9 = vpop.f32.mrf.mxu0 }
  0xef   : > { %v492_v10 = vadd.f32 %v491_v9, %v473_v8 }
  0xf1   : > { %v511_v11 = vpop.f32.mrf.mxu1 }
  0xf2   : > { %v512_v12 = vadd.f32 %v511_v11, %v492_v10  ;;  %v531_v13 = vpop.f32.mrf.mxu2 }
  0xf4   : > { %v532_v14 = vadd.f32 %v531_v13, %v512_v12 }
  0xf5   : > { %v551_v15 = vpop.f32.mrf.mxu3 }
  0xf6   : > { %v552_v16 = vadd.f32 %v551_v15, %v532_v14 }
  0xf8   : > { %v571_v17 = vpop.f32.mrf.mxu0 }
  0xf9   : > { %v572_v18 = vadd.f32 %v571_v17, %v552_v16 }
  0xfb   : > { %v591_v19 = vpop.f32.mrf.mxu1 }
  0xfc   : > { %v592_v20 = vadd.f32 %v591_v19, %v572_v18  ;;  %v611_v21 = vpop.f32.mrf.mxu2 }
  0xfe   : > { %v612_v22 = vadd.f32 %v611_v21, %v592_v20 }
  0xff   : > { %v631_v23 = vpop.f32.mrf.mxu3 }
 0x100   : > { %v632_v25 = vadd.f32 %v631_v23, %v612_v22 }
 0x112   : > { %v651_v24 = vpop.f32.mrf.mxu0 }
 0x113   : > { %v652_v26 = vadd.f32 %v651_v24, %v632_v25 }
 0x114   : > { %v671_v27 = vpop.f32.mrf.mxu1 }
 0x115   : > { %v672_v29 = vadd.f32 %v671_v27, %v652_v26 }
 0x118   : > { %v691_v28 = vpop.f32.mrf.mxu2 }
 0x119   : > { %v692_v34 = vadd.f32 %v691_v28, %v672_v29 }
 0x11b   : > { %v711_v35 = vpop.f32.mrf.mxu3 }
 0x11c   : > { %v712_v36 = vadd.f32 %v711_v35, %v692_v34 }
 0x132   : > { %v731_v37 = vpop.f32.mrf.mxu0 }
 0x133   : > { %v732_v38 = vadd.f32 %v731_v37, %v712_v36 }
 0x135   : > { %v751_v39 = vpop.f32.mrf.mxu1 }
 0x136   : > { %v752_v40 = vadd.f32 %v751_v39, %v732_v38 }
 0x138   : > { %v891_v41 = vmul.f32 -1.442695, %v752_v40 }
 0x13a   : > { %964 = vpow2.f32 %v891_v41 }
 0x140   : > { %v965_v42 = vpop.eup %964 }
 0x141   : > { %v757_v43 = vadd.f32 1.0, %v965_v42 }
 0x143   : > { %966 = vrcp.f32 %v757_v43  ;;  %v769_v56 = vand.u32 2147483648, %v757_v43  ;;  %v767_v48 = vand.u32 2147483647, %v757_v43  ;;  %vm763_vm2 = vweird.f32 %v757_v43 }
 0x145   : > { %v770_v50 = vor.u32 1.1754944e-38, %v769_v56  ;;  %vm768_vm4 = vcmp.eq.f32.partialorder %v767_v48, 8.507059e+37 }
 0x149   : > { %v967_v44 = vpop.eup %966 }
 0x14a   : > { %v759_v45 = vmul.f32 %v967_v44, %v757_v43  ;;  %vm764_vm1 = vweird.f32 %v967_v44 }
 0x14b   : > { %vm765_vm3 = vmor %vm763_vm2, %vm764_vm1 }
 0x14c   : > { %v760_v46 = vsub.f32 1.0, %v759_v45 }
 0x14e   : > { %v761_v47 = vmul.f32 %v967_v44, %v760_v46 }
 0x150   : > { %v762_v49 = vadd.f32 %v967_v44, %v761_v47 }
 0x152   : > { %v766_v51 = vsel %vm765_vm3, %v967_v44, %v762_v49 }
 0x153   : > { %v771_v52 = vsel %vm768_vm4, %v770_v50, %v766_v51 }
 0x154   : > { %v773_v53 = vmul.f32 %v771_v52, %v1250_v30  ;;  %v774_v54 = vmul.f32 %v771_v52, %v1253_v31  ;;  %v775_v55 = vmul.f32 %v771_v52, %v1256_v32  ;;  %v776_v57 = vmul.f32 %v771_v52, %v1259_v33 }
 0x156   : > { %777 = vst [vmem:[%s208_s21] sm:$0xff] %v773_v53 }
 0x157   : > { %778 = vst [vmem:[%s208_s21 + $0x8] sm:$0xff] %v774_v54 }
 0x158   : > { %779 = vst [vmem:[%s208_s21 + $0x10] sm:$0xff] %v775_v55 }
 0x159   : > { %780 = vst [vmem:[%s208_s21 + $0x18] sm:$0xff] %v776_v57 }
 0x15a   : > { %1055 = shalt.err (!%p1052_p10)
}
 0x15b   : > { %s1105_s7 = smov 128   ;;  %s1106_s11 = smov 8  }
 0x15c   : > { %905 = dma.vmem_to_hbm [thread:$0]  (%p1199_p3), %s795_s22, 512, %s797_s23, %s782_s2, %s1105_s7, %s1105_s7, %s1106_s11  }
 0x15d PF: > { %s811_s12 = sand.u32 1, %s1086_s14   ;;  %p1328_p12 = scmp.ge.s32.totalorder %s1098_s17, 2 }
 0x15e   : > { %s812_s18 = scalar_lea.sflag [#allocation6], %s811_s12 }
 0x15f   : > { %p916_p13 = pnand %p1328_p12, %p1165_p6 }
 0x161   : > { %p917_p0 = pneg %p916_p13 }
 0x163   : > { %1081 = dma.done.wait (%p917_p0), %s812_s18, 512  }
 0x164   : > { %1083 = vsyncadd (%p917_p0), %s812_s18, 4294966784  ;;  %p18_p5 = scmp.ge.s32.totalorder %s1183_s27, 4   ;;  %s1329_s14 = smov %s1090_s15 }
 0x165   : > { %s1330_s15 = smov %s1094_s16  ;;  %s1331_s16 = smov %s1195_s5 }
 0x166   : > { %s1332_s17 = smov %s1183_s27  ;;  %20 = sbr.rel (!%p18_p5) target bundleno = 8 (0x8), region = 82 }
 0x16b   :  { %818 = vsyncpa [#allocation5], 1 }
 0x16c   :  { %820 = vsyncpa [#allocation5 + $0x1], 1 }
 0x16d   :  { %821 = vsyncpa [#allocation8], 1 }
 0x16e   :  { %822 = vsyncpa [#allocation6], 1 }
 0x16f   :  { %824 = vsyncpa [#allocation6 + $0x1], 1 }

</bundles_post_ra>
